<compile_context>
chip_gen: v5e
topology: v5e:2x2
jax: 0.10.0
libtpu: 0.0.40
codegen_flags: <defaults>
</compile_context>

<pallas_src>
import jax
import jax.numpy as jnp
from jax.experimental import pallas as pl
from jax.experimental.pallas import tpu as pltpu


def _round_up(x, m):
    return ((x + m - 1) // m) * m


def _generation_params():
    """(target x+mask bytes per grid step, vmem_limit_bytes), per generation."""
    vmem_cap = 128 * 1024 * 1024
    try:
        if jax.devices()[0].platform == "tpu":
            vmem_cap = pltpu.get_tpu_info().vmem_capacity_bytes
    except Exception:
        pass
    if vmem_cap <= 64 * 1024 * 1024:            # v7x-class: 64 MiB physical VMEM
        return 12 * 1024 * 1024, 40 * 1024 * 1024
    return 16 * 1024 * 1024, 64 * 1024 * 1024    # v5e / v6e: 128 MiB physical


def _tile_cost_bytes(tb, ts, H, x_item, m_item):
    """Padded VMEM bytes of one (TB,TS,H) x block plus its (TB,1,TS) mask block."""
    cost = tb * _round_up(max(ts, 1), 8) * _round_up(H, 128) * x_item
    if m_item is not None:
        cost += tb * 8 * _round_up(max(ts, 1), 128) * m_item
    return cost


def _choose_tiles(B, S, H, x_item, m_item, target_bytes):
    """Pick (TB, TS).  TS is S (no S tiling) or a multiple of 128."""
    row_cost = _tile_cost_bytes(1, S, H, x_item, m_item)
    if row_cost <= target_bytes:
        ts = S
        tb = max(1, target_bytes // row_cost)
        if tb >= B:
            tb = B
            if B >= 16:                       # keep both v7x TensorCores busy
                tb = (B + 1) // 2
        else:
            tb = min(tb, (B + 1) // 2)        # balanced >=2 grid steps
    else:
        # Long sequence: tile S; f32 accumulators carry the reduction.
        tb = min(B, 8)
        chunk = _tile_cost_bytes(tb, 128, H, x_item, m_item)
        ts = max(128, (target_bytes // max(1, chunk)) * 128)
        if ts >= S:
            ts = S
        while tb > 1 and _tile_cost_bytes(tb, ts, H, x_item, m_item) > target_bytes:
            tb = max(1, tb // 2)
    return tb, ts


def _make_kernel(masked, seq_len, block_s, needs_tail_mask):
    """Kernel factory; variants are specialized at trace time."""

    def kernel(*refs):
        if masked:
            x_ref, w_ref, m_ref, o_ref, num_acc, den_acc = refs
        else:
            x_ref, w_ref, o_ref, num_acc, den_acc = refs
        k = pl.program_id(1)

        @pl.when(k == 0)
        def _init():
            num_acc[...] = jnp.zeros_like(num_acc)
            den_acc[...] = jnp.zeros_like(den_acc)

        x = x_ref[...]                              # (TB, TS, H) input dtype
        tb, ts, h = x.shape

        if needs_tail_mask:
            # Last S tile may read out-of-bounds padding; zero those rows so
            # inf/nan garbage cannot reach the accumulators of valid rows.
            row = k * block_s + jax.lax.broadcasted_iota(jnp.int32, (tb, ts, 1), 1)
            x = jnp.where(row < seq_len, x, 0)

        # Score projection (Linear(H,1,bias=False)) as a q=1 batched matmul.
        wq = jnp.broadcast_to(w_ref[...].reshape(1, 1, h), (tb, 1, h)).astype(x.dtype)
        alpha = jnp.einsum(
            'bqh,bsh->bqs', wq, x,
            preferred_element_type=jnp.float32,
            precision=jax.lax.Precision.HIGHEST)    # (TB, 1, TS) f32

        e = jnp.exp(alpha)                          # unstabilized, like PyTorch
        if masked:
            e = e * m_ref[...].astype(jnp.float32)  # multiplicative mask
        if needs_tail_mask:
            col = k * block_s + jax.lax.broadcasted_iota(jnp.int32, e.shape, 2)
            e = jnp.where(col < seq_len, e, 0.0)

        den_acc[...] += jnp.sum(e, axis=-1, keepdims=True)          # (TB,1,1)
        num_acc[...] += jnp.einsum(
            'bqs,bsh->bqh', e.astype(x.dtype), x,
            preferred_element_type=jnp.float32,
            precision=jax.lax.Precision.HIGHEST)                    # (TB,1,H)

        @pl.when(k == pl.num_programs(1) - 1)
        def _finalize():
            o_ref[...] = (num_acc[...] / (den_acc[...] + 1e-9)).astype(o_ref.dtype)

    return kernel


def self_attention_forward(inputs, weight, mask=None, *, block_b=None,
                           block_s=None, target_tile_bytes=None):
    """inputs: (B, S, H); weight: nn.Linear(H, 1, bias=False) weight (any shape
    with H elements); mask: (B, S) or None.  Returns (B, H)."""
    if inputs.ndim != 3:
        raise ValueError('! Wrong dimemsion of the inputs parameters.')
    B, S, H = inputs.shape
    w = weight.reshape(1, H)                        # lane-dense weight row

    default_target, vmem_limit = _generation_params()
    target = target_tile_bytes if target_tile_bytes is not None else default_target

    masked = mask is not None
    if masked:
        if mask.dtype == jnp.bool_:
            mask = mask.astype(jnp.int8)            # avoid bool DMA; tiny (B*S)
        m3 = mask.reshape(B, 1, S)                  # free reshape, lane-dense S
        m_item = jnp.dtype(m3.dtype).itemsize
    else:
        m3 = None
        m_item = None

    x_item = jnp.dtype(inputs.dtype).itemsize
    tb, ts = _choose_tiles(B, S, H, x_item, m_item, target)
    if block_b is not None:
        tb = max(1, min(block_b, B))
    if block_s is not None:
        ts = max(1, min(block_s, S))
    needs_tail = (S % ts) != 0

    grid = (pl.cdiv(B, tb), pl.cdiv(S, ts))

    x_spec = pl.BlockSpec((tb, ts, H), lambda b, k: (b, k, 0))
    w_spec = pl.BlockSpec((1, H), lambda b, k: (0, 0))
    o_spec = pl.BlockSpec((tb, 1, H), lambda b, k: (b, 0, 0))
    in_specs = [x_spec, w_spec]
    args = [inputs, w]
    if masked:
        in_specs.append(pl.BlockSpec((tb, 1, ts), lambda b, k: (b, 0, k)))
        args.append(m3)

    kernel = _make_kernel(masked, S, ts, needs_tail)

    out = pl.pallas_call(
        kernel,
        out_shape=jax.ShapeDtypeStruct((B, 1, H), inputs.dtype),
        grid_spec=pltpu.PrefetchScalarGridSpec(
            num_scalar_prefetch=0,
            grid=grid,
            in_specs=in_specs,
            out_specs=o_spec,
            scratch_shapes=[pltpu.VMEM((tb, 1, H), jnp.float32),
                            pltpu.VMEM((tb, 1, 1), jnp.float32)]),
        compiler_params=pltpu.CompilerParams(
            dimension_semantics=("parallel", "arbitrary"),
            vmem_limit_bytes=vmem_limit),
    )(*args)
    return out.reshape(B, H)


def _reference(inputs, weight, mask=None):
    """Plain-JAX mirror of the PyTorch forward."""
    B, S, H = inputs.shape
    alpha = jnp.einsum('bsh,h->bs', inputs, weight.reshape(H),
                       precision=jax.lax.Precision.HIGHEST)
    e = jnp.exp(alpha)
    if mask is not None:
        e = e * mask.astype(jnp.float32)
    p = e / (jnp.sum(e, axis=-1, keepdims=True) + 1e-9)
    return jnp.einsum('bs,bsh->bh', p, inputs,
                      precision=jax.lax.Precision.HIGHEST)


if __name__ == "__main__":
    key = jax.random.PRNGKey(0)
    k1, k2, k3, k4, k5, k6, k7, k8, k9 = jax.random.split(key, 9)

    # Tolerance leaves headroom for MXU pass-precision differences on HW.
    ATOL = RTOL = 5e-3

    # Module-consistent small shapes: batch=2, max_seq_len=8, n_hidden=32.
    B, S, H = 2, 8, 32
    x = jax.random.normal(k1, (B, S, H), dtype=jnp.float32)
    w = jax.random.normal(k2, (1, H), dtype=jnp.float32) * 0.02   # Linear(H,1).weight
    mask = (jax.random.uniform(k3, (B, S)) > 0.2).astype(jnp.float32)

    out = jax.block_until_ready(self_attention_forward(x, w, mask))
    assert out.shape == (B, H)
    assert jnp.allclose(out, _reference(x, w, mask), atol=ATOL, rtol=RTOL)

    # mask=None specialized path (no mask DMA stream).
    out2 = jax.block_until_ready(self_attention_forward(x, w, None))
    assert jnp.allclose(out2, _reference(x, w, None), atol=ATOL, rtol=RTOL)

    # Multi-step batch grid (3 batch tiles).
    B2 = 24
    x2 = jax.random.normal(k4, (B2, S, H), dtype=jnp.float32)
    mask2 = (jax.random.uniform(k5, (B2, S)) > 0.2).astype(jnp.float32)
    out3 = jax.block_until_ready(self_attention_forward(x2, w, mask2, block_b=8))
    assert out3.shape == (B2, H)
    assert jnp.allclose(out3, _reference(x2, w, mask2), atol=ATOL, rtol=RTOL)

    # S-tiled accumulator path: grid=(2, 2), exact 128-sized sequence tiles.
    B3, S3 = 4, 256
    x3 = jax.random.normal(k6, (B3, S3, H), dtype=jnp.float32)
    mask3 = (jax.random.uniform(k7, (B3, S3)) > 0.2).astype(jnp.float32)
    out4 = jax.block_until_ready(
        self_attention_forward(x3, w, mask3, block_b=2, block_s=128))
    assert jnp.allclose(out4, _reference(x3, w, mask3), atol=ATOL, rtol=RTOL)

    # Ragged tails on both grid axes (B=3 with TB=2, S=200 with TS=128).
    B4, S4 = 3, 200
    x4 = jax.random.normal(k8, (B4, S4, H), dtype=jnp.float32)
    mask4 = (jax.random.uniform(k9, (B4, S4)) > 0.2).astype(jnp.float32)
    out5 = jax.block_until_ready(
        self_attention_forward(x4, w, mask4, block_b=2, block_s=128))
    assert jnp.allclose(out5, _reference(x4, w, mask4), atol=ATOL, rtol=RTOL)

    print("KERNEL_OK")
</pallas_src>

<mosaic_0001>
module attributes {stable_mosaic.version = 11 : i64} {
  func.func @kernel(%arg0: i32, %arg1: i32, %arg2: memref<2x8x32xf32, #tpu.memory_space<vmem>>, %arg3: memref<1x32xf32, #tpu.memory_space<vmem>>, %arg4: memref<2x1x8xf32, #tpu.memory_space<vmem>>, %arg5: memref<2x1x32xf32, #tpu.memory_space<vmem>>, %arg6: memref<2x1x32xf32, #tpu.memory_space<vmem>>, %arg7: memref<2x1x1xf32, #tpu.memory_space<vmem>>) attributes {dimension_semantics = [#tpu.dimension_semantics<parallel>, #tpu.dimension_semantics<arbitrary>], iteration_bounds = array<i64: 1, 1>, scalar_prefetch = 0 : i64, scratch_operands = 2 : i64, tpu.core_type = #tpu.core_type<tc>, window_params = [{transform_indices = @transform_0, window_bounds = array<i64: 2, 8, 32>}, {pipeline_mode = #tpu.pipeline_mode<synchronous>, transform_indices = @transform_1, window_bounds = array<i64: 1, 32>}, {transform_indices = @transform_2, window_bounds = array<i64: 2, 1, 8>}, {transform_indices = @transform_3, window_bounds = array<i64: 2, 1, 32>}]} {
    %c0_i32 = arith.constant 0 : i32
    %0 = arith.cmpi eq, %arg1, %c0_i32 : i32
    %1 = arith.extui %0 : i1 to i32
    %c0_i32_0 = arith.constant 0 : i32
    %2 = arith.cmpi ne, %1, %c0_i32_0 : i32
    scf.if %2 {
      %cst_24 = arith.constant 0.000000e+00 : f32
      %24 = vector.broadcast %cst_24 : f32 to vector<2x1x32xf32>
      %c0_25 = arith.constant 0 : index
      %c0_26 = arith.constant 0 : index
      %c0_27 = arith.constant 0 : index
      %25 = vector.load %arg6[%c0_25, %c0_26, %c0_27] : memref<2x1x32xf32, #tpu.memory_space<vmem>>, vector<2x1x32xf32>
      tpu.vector_store %arg6[%c0_25, %c0_26, %c0_27], %24 {strides = array<i32>} : memref<2x1x32xf32, #tpu.memory_space<vmem>>, vector<2x1x32xf32>,
      %cst_28 = arith.constant 0.000000e+00 : f32
      %26 = vector.broadcast %cst_28 : f32 to vector<2x1x1xf32>
      %c0_29 = arith.constant 0 : index
      %c0_30 = arith.constant 0 : index
      %c0_31 = arith.constant 0 : index
      %27 = vector.load %arg7[%c0_29, %c0_30, %c0_31] : memref<2x1x1xf32, #tpu.memory_space<vmem>>, vector<2x1x1xf32>
      tpu.vector_store %arg7[%c0_29, %c0_30, %c0_31], %26 {strides = array<i32>} : memref<2x1x1xf32, #tpu.memory_space<vmem>>, vector<2x1x1xf32>,
    } else {
    }
    %c0 = arith.constant 0 : index
    %c0_1 = arith.constant 0 : index
    %c0_2 = arith.constant 0 : index
    %3 = vector.load %arg2[%c0, %c0_1, %c0_2] : memref<2x8x32xf32, #tpu.memory_space<vmem>>, vector<2x8x32xf32>
    %c0_3 = arith.constant 0 : index
    %c0_4 = arith.constant 0 : index
    %4 = vector.load %arg3[%c0_3, %c0_4] : memref<1x32xf32, #tpu.memory_space<vmem>>, vector<1x32xf32>
    %5 = vector.shape_cast %4 : vector<1x32xf32> to vector<1x1x32xf32>
    %6 = vector.shape_cast %5 : vector<1x1x32xf32> to vector<1x1x32xf32>
    %7 = vector.broadcast %6 : vector<1x1x32xf32> to vector<2x1x32xf32>
    "tpu.trace_start"() <{level = 10 : i32, message = "bqh,bsh->bqs"}> : () -> ()
    %cst = arith.constant dense<0.000000e+00> : vector<2x1x8xf32>
    %8 = tpu.matmul %7, %3, %cst {dimension_numbers = #tpu.dot_dimension_numbers<[2], [2], [1], [1], [0, 0, 0, 1, 1, 1], [0], [0]>, precision = #tpu.contract_precision<fp32>} : vector<2x1x32xf32>, vector<2x8x32xf32>, vector<2x1x8xf32> -> vector<2x1x8xf32>
    "tpu.trace_stop"() : () -> ()
    %9 = math.exp %8 : vector<2x1x8xf32>
    %c0_5 = arith.constant 0 : index
    %c0_6 = arith.constant 0 : index
    %c0_7 = arith.constant 0 : index
    %10 = vector.load %arg4[%c0_5, %c0_6, %c0_7] : memref<2x1x8xf32, #tpu.memory_space<vmem>>, vector<2x1x8xf32>
    %11 = arith.mulf %9, %10 : vector<2x1x8xf32>
    %c0_8 = arith.constant 0 : index
    %c0_9 = arith.constant 0 : index
    %c0_10 = arith.constant 0 : index
    %12 = vector.load %arg7[%c0_8, %c0_9, %c0_10] : memref<2x1x1xf32, #tpu.memory_space<vmem>>, vector<2x1x1xf32>
    %cst_11 = arith.constant dense<0.000000e+00> : vector<2x1xf32>
    %13 = vector.multi_reduction <add>, %11, %cst_11 [2] : vector<2x1x8xf32> to vector<2x1xf32>
    %14 = vector.shape_cast %13 : vector<2x1xf32> to vector<2x1x1xf32>
    %15 = arith.addf %12, %14 : vector<2x1x1xf32>
    %c0_12 = arith.constant 0 : index
    %c0_13 = arith.constant 0 : index
    %c0_14 = arith.constant 0 : index
    %16 = vector.load %arg7[%c0_12, %c0_13, %c0_14] : memref<2x1x1xf32, #tpu.memory_space<vmem>>, vector<2x1x1xf32>
    tpu.vector_store %arg7[%c0_12, %c0_13, %c0_14], %15 {strides = array<i32>} : memref<2x1x1xf32, #tpu.memory_space<vmem>>, vector<2x1x1xf32>,
    %c0_15 = arith.constant 0 : index
    %c0_16 = arith.constant 0 : index
    %c0_17 = arith.constant 0 : index
    %17 = vector.load %arg6[%c0_15, %c0_16, %c0_17] : memref<2x1x32xf32, #tpu.memory_space<vmem>>, vector<2x1x32xf32>
    "tpu.trace_start"() <{level = 10 : i32, message = "bqs,bsh->bqh"}> : () -> ()
    %cst_18 = arith.constant dense<0.000000e+00> : vector<2x1x32xf32>
    %18 = tpu.matmul %11, %3, %cst_18 {dimension_numbers = #tpu.dot_dimension_numbers<[2], [1], [1], [2], [0, 0, 0, 1, 1, 2], [0], [0]>, precision = #tpu.contract_precision<fp32>} : vector<2x1x8xf32>, vector<2x8x32xf32>, vector<2x1x32xf32> -> vector<2x1x32xf32>
    "tpu.trace_stop"() : () -> ()
    %19 = arith.addf %17, %18 : vector<2x1x32xf32>
    %c0_19 = arith.constant 0 : index
    %c0_20 = arith.constant 0 : index
    %c0_21 = arith.constant 0 : index
    %20 = vector.load %arg6[%c0_19, %c0_20, %c0_21] : memref<2x1x32xf32, #tpu.memory_space<vmem>>, vector<2x1x32xf32>
    tpu.vector_store %arg6[%c0_19, %c0_20, %c0_21], %19 {strides = array<i32>} : memref<2x1x32xf32, #tpu.memory_space<vmem>>, vector<2x1x32xf32>,
    %c0_i32_22 = arith.constant 0 : i32
    %21 = arith.cmpi eq, %arg1, %c0_i32_22 : i32
    %22 = arith.extui %21 : i1 to i32
    %c0_i32_23 = arith.constant 0 : i32
    %23 = arith.cmpi ne, %22, %c0_i32_23 : i32
    scf.if %23 {
      %c0_24 = arith.constant 0 : index
      %c0_25 = arith.constant 0 : index
      %c0_26 = arith.constant 0 : index
      %24 = vector.load %arg6[%c0_24, %c0_25, %c0_26] : memref<2x1x32xf32, #tpu.memory_space<vmem>>, vector<2x1x32xf32>
      %c0_27 = arith.constant 0 : index
      %c0_28 = arith.constant 0 : index
      %c0_29 = arith.constant 0 : index
      %25 = vector.load %arg7[%c0_27, %c0_28, %c0_29] : memref<2x1x1xf32, #tpu.memory_space<vmem>>, vector<2x1x1xf32>
      %cst_30 = arith.constant 9.99999971E-10 : f32
      %26 = vector.broadcast %cst_30 : f32 to vector<2x1x1xf32>
      %27 = arith.addf %25, %26 : vector<2x1x1xf32>
      %28 = vector.broadcast %27 : vector<2x1x1xf32> to vector<2x1x32xf32>
      %29 = arith.divf %24, %28 : vector<2x1x32xf32>
      %c0_31 = arith.constant 0 : index
      %c0_32 = arith.constant 0 : index
      %c0_33 = arith.constant 0 : index
      %30 = vector.load %arg5[%c0_31, %c0_32, %c0_33] : memref<2x1x32xf32, #tpu.memory_space<vmem>>, vector<2x1x32xf32>
      tpu.vector_store %arg5[%c0_31, %c0_32, %c0_33], %29 {strides = array<i32>} : memref<2x1x32xf32, #tpu.memory_space<vmem>>, vector<2x1x32xf32>,
    } else {
    }
    return
  }
  func.func @transform_0(%arg0: i32, %arg1: i32) -> (i32, i32, i32) {
    %c0_i32 = arith.constant 0 : i32
    %c0_i32_0 = arith.constant 0 : i32
    return %arg0, %arg1, %c0_i32 : i32, i32, i32
  }
  func.func @transform_1(%arg0: i32, %arg1: i32) -> (i32, i32) {
    %c0_i32 = arith.constant 0 : i32
    %c0_i32_0 = arith.constant 0 : i32
    %c0_i32_1 = arith.constant 0 : i32
    return %c0_i32, %c0_i32_0 : i32, i32
  }
  func.func @transform_2(%arg0: i32, %arg1: i32) -> (i32, i32, i32) {
    %c0_i32 = arith.constant 0 : i32
    %c0_i32_0 = arith.constant 0 : i32
    return %arg0, %c0_i32, %arg1 : i32, i32, i32
  }
  func.func @transform_3(%arg0: i32, %arg1: i32) -> (i32, i32, i32) {
    %c0_i32 = arith.constant 0 : i32
    %c0_i32_0 = arith.constant 0 : i32
    %c0_i32_1 = arith.constant 0 : i32
    return %arg0, %c0_i32, %c0_i32_0 : i32, i32, i32
  }
}

</mosaic_0001>

<bundles_post_ra>
// kernel: tpu_custom_call.1
= control target key start
LH: loop header
LB: loop body
LE: loop exit
PB: predicated region body
PF: predicated region fallthrough
CT: control target
= control target key end

     0   :  { %8 = vsyncpa [#allocation5], 0  ;;  %s966_s0 = inlined_call_operand.hbm [shape: f32[2,8,32], index: 0, kind: input, shape index: {}]   ;;  %s967_s1 = inlined_call_operand.hbm [shape: f32[1,32], index: 1, kind: input, shape index: {}]   ;;  %s968_s2 = inlined_call_operand.hbm [shape: f32[2,1,8], index: 2, kind: input, shape index: {}]   ;;  %s969_s3 = inlined_call_operand.hbm [shape: f32[2,1,32], index: 3, kind: output, shape index: {}]  }
   0x1   :  { %9 = vsyncpa [#allocation8], 0  ;;  %s29_s14 = sshll.u32 %s967_s1, 4  ;;  %s30_s14 = int_to_ptr.hbm [resolvable:$true] %s29_s14 }
   0x2   :  { %10 = vsyncpa [#allocation6], 0  ;;  %s898_s15 = smov [#allocation7]   ;;  %s15_s19 = sshll.u32 %s966_s0, 4  ;;  %s16_s19 = int_to_ptr.hbm [resolvable:$true] %s15_s19 }
   0x3   :  { %s31_s16 = sshll.u32 %s898_s15, 4  ;;  %s899_s20 = smov [#allocation4]   ;;  %s32_s16 = int_to_ptr.vmem [resolvable:$true] %s31_s16 }
   0x4   :  { %34 = dma.hbm_to_vmem [thread:$0]  %s30_s14, 16, %s32_s16, [#allocation8]  }
   0x5   :  { %s17_s21 = sshll.u32 %s899_s20, 4  ;;  %s900_s22 = smov 128   ;;  %s18_s21 = int_to_ptr.vmem [resolvable:$true] %s17_s21 }
   0x6   :  { %s901_s23 = smov 8   ;;  %s39_s1 = sshll.u32 %s968_s2, 4  ;;  %s40_s1 = int_to_ptr.hbm [resolvable:$true] %s39_s1 }
   0x7   :  { %23 = dma.hbm_to_vmem [thread:$0]  %s16_s19, 256, %s18_s21, [#allocation5], %s900_s22, %s900_s22, %s901_s23  }
   0x8   :  { %s902_s26 = smov [#allocation9]   ;;  %s903_s28 = smov 16  }
   0x9   :  { %s41_s27 = sshll.u32 %s902_s26, 4  ;;  %s904_s29 = smov 1   ;;  %s42_s27 = int_to_ptr.vmem [resolvable:$true] %s41_s27 }
   0xa   :  { %47 = dma.hbm_to_vmem [thread:$0]  %s40_s1, 32, %s42_s27, [#allocation8], %s903_s28, %s903_s28, %s904_s29  }
   0xb   :  { %892 = dma.done.wait [#allocation5], 256  }
   0xc   :  { %893 = vsyncadd [#allocation5], 4294967040 }
   0xd   :  { %894 = dma.done.wait [#allocation8], 48  }
   0xe   :  { %895 = vsyncadd [#allocation8], 4294967248  ;;  %vm73_vm0 = vcmask 261120   ;;  %v70_v0 = vld [vmem:[#allocation4] sm:$0xff]  ;;  %v72_v1 = vld [vmem:[#allocation7] sm:$0x1] }
   0xf   :  { %v71_v2 = vld [vmem:[#allocation4 + $0x8] sm:$0xff]  ;;  %v78_v3 = vsel %vm73_vm0, %v70_v0, 0  ;;  %v75_v4 = vsel %vm73_vm0, %v72_v1, 0  ;;  %v418_v21 = vand.u32 4294901760, %v70_v0  ;;  %v379_v51 = vld [vmem:[#allocation9] sm:$0x1] }
  0x10   :  { %v227_v5 = vsel %vm73_vm0, %v71_v2, 0  ;;  %v95_v6 = vand.u32 4294901760, %v78_v3  ;;  %v97_v7 = vand.u32 4294901760, %v75_v4  ;;  %v940_v23 = vand.u32 4294901760, %v71_v2  ;;  %v380_v1 = vld [vmem:[#allocation9 + $0x1] sm:$0x1] }
  0x11   :  { %v244_v8 = vand.u32 4294901760, %v227_v5  ;;  %v445_v22 = vsub.f32 %v70_v0, %v418_v21  ;;  %vm385_vm1 = vcmask 57344   ;;  %vm399_vm2 = vcmask 64512   ;;  %s907_s0 = smov [#allocation10]   ;;  %s762_s5 = sshll.u32 %s969_s3, 4  ;;  %s763_s5 = int_to_ptr.hbm [resolvable:$true] %s762_s5 }
  0x12   :  { %v122_v9 = vsub.f32 %v78_v3, %v95_v6  ;;  %172 = vmatpush.xpose.msra.mxu3 %v95_v6  ;;  %96 = vmatpush.xpose.msra.mxu0 %v95_v6  ;;  %v98_v10 = vsub.f32 %v75_v4, %v97_v7  ;;  %v594_v27 = vsub.f32 %v71_v2, %v940_v23  ;;  %vm67_vm3 = vcmask 0   ;;  %s760_s2 = sshll.u32 %s907_s0, 4  ;;  %s761_s2 = int_to_ptr.vmem [resolvable:$true] %s760_s2 }
  0x13   :  { %v271_v11 = vsub.f32 %v227_v5, %v244_v8  ;;  %v446_v24 = vand.u32 4294901760, %v445_v22  ;;  %v905_v59 = vmov 0.0   ;;  %vm64_vm4 = vcmask 253952  }
  0x14   :  { %149 = vmatpush.xpose.msra.mxu2 %v122_v9  ;;  %v99_v12 = vand.u32 4294901760, %v98_v10  ;;  %v123_v13 = vand.u32 4294901760, %v122_v9  ;;  %v595_v29 = vand.u32 4294901760, %v594_v27  ;;  %68 = vst.msk [vmem:[#allocation3] sm:$0x1] %vm67_vm3, %v905_v59 }
  0x15   :  { %v272_v14 = vand.u32 4294901760, %v271_v11  ;;  %v447_v25 = vsub.f32 %v445_v22, %v446_v24  ;;  %69 = vst.msk [vmem:[#allocation3 + $0x1] sm:$0x1] %vm67_vm3, %v905_v59 }
  0x16   :  { %176 = vmatmul.f32.vlgmr.msra.gmra.mxu3 %v99_v12  ;;  %v100_v15 = vsub.f32 %v98_v10, %v99_v12  ;;  %v124_v16 = vsub.f32 %v122_v9, %v123_v13  ;;  %198 = vmatpush.xpose.msrb.mxu0 %v123_v13  ;;  %v596_v33 = vsub.f32 %v594_v27, %v595_v29 }
  0x17   :  { %v273_v17 = vsub.f32 %v271_v11, %v272_v14  ;;  %152 = vmatmul.f32.vlgmr.msra.gmra.mxu2 %v98_v10  ;;  %v448_v26 = vand.u32 4294901760, %v447_v25  ;;  %65 = vst.msk [vmem:[#allocation2] sm:$0x1] %vm64_vm4, %v905_v59 }
  0x18   :  { %245 = vmatpush.xpose.msrb.mxu2 %v244_v8  ;;  %v101_v18 = vand.u32 4294901760, %v100_v15  ;;  %v125_v19 = vand.u32 4294901760, %v124_v16  ;;  %v597_v35 = vand.u32 4294901760, %v596_v33  ;;  %66 = vst.msk [vmem:[#allocation2 + $0x1] sm:$0x1] %vm64_vm4, %v905_v59 }
  0x19   :  { %v274_v20 = vand.u32 4294901760, %v273_v17 }
  0x1a   :  { %102 = vmatmul.f32.vlgmr.msra.gmra.mxu0 %v101_v18  ;;  %126 = vmatpush.xpose.msra.mxu1 %v125_v19 }
  0x1b   :  { %275 = vmatpush.xpose.msrb.mxu3 %v274_v20  ;;  %298 = vmatpush.xpose.msra.mxu0 %v271_v11  ;;  %v383_v13 = vld [vmem:[#allocation3] sm:$0x1] }
  0x1c   :  { %347 = vmatpush.xpose.msra.mxu2 %v272_v14  ;;  %v384_v16 = vld [vmem:[#allocation3 + $0x1] sm:$0x1] }
  0x1d   :  { %128 = vmatmul.f32.vlgmr.msra.gmra.mxu1 %v97_v7 }
  0x1e   :  { %220 = vmatpush.xpose.msrb.mxu1 %v95_v6  ;;  %277 = vmatmul.f32.vlgmr.msrb.gmra.mxu3 %v97_v7  ;;  %v397_v33 = vld [vmem:[#allocation2] sm:$0x1] }
  0x1f   :  { %369 = vmatpush.xpose.msra.mxu3 %v244_v8  ;;  %251 = vmatmul.f32.vlgmr.msrb.gmra.mxu2 %v101_v18 }
  0x20   :  { %472 = vmatpush.msrb.mxu2 %v445_v22 }
  0x22   :  { %321 = vmatpush.xpose.msra.mxu1 %v244_v8  ;;  %200 = vmatmul.f32.vlgmr.msrb.gmra.mxu0 %v97_v7 }
  0x23   :  { %495 = vmatpush.msrb.mxu3 %v418_v21  ;;  %419 = vmatpush.msrb.mxu0 %v418_v21 }
  0x25   :  { %222 = vmatmul.f32.vlgmr.msrb.gmra.mxu1 %v97_v7 }
  0x26   :  { %371 = vmatmul.f32.vlgmr.msra.gmra.mxu3 %v97_v7  ;;  %449 = vmatpush.msrb.mxu1 %v448_v26 }
  0x27   :  { %349 = vmatmul.f32.vlgmr.msra.gmra.mxu2 %v97_v7  ;;  %598 = vmatpush.msra.mxu3 %v597_v35 }
  0x28   :  { %568 = vmatpush.msra.mxu2 %v940_v23 }
  0x2a   :  { %301 = vmatmul.f32.vlgmr.msra.gmra.mxu0 %v98_v10 }
  0x2b   :  { %521 = vmatpush.msra.mxu0 %v446_v24 }
  0x2d   :  { %325 = vmatmul.f32.vlgmr.msra.gmra.mxu1 %v99_v12  ;;  %v906_v12 = vmov 0  }
  0x2e   :  { %543 = vmatpush.msra.mxu1 %v418_v21  ;;  %786 = vset.pattern.permute.xlu1 %v906_v12 }
  0x2f   :  { %787 = vset.pattern.permute.xlu0 %v906_v12 }
  0x97   :  { %v103_v28 = vpop.f32.mrf.mxu0 }
  0x99   :  { %v177_v30 = vpop.f32.mrf.mxu3 }
  0x9a   :  { %v129_v31 = vpop.f32.mrf.mxu1  ;;  %v153_v32 = vpop.f32.mrf.mxu2 }
  0x9b   :  { %v130_v34 = vadd.f32 %v129_v31, %v103_v28 }
  0x9d   :  { %v154_v36 = vadd.f32 %v153_v32, %v130_v34 }
  0x9f   :  { %v178_v37 = vadd.f32 %v177_v30, %v154_v36  ;;  %v201_v38 = vpop.f32.mrf.mxu0 }
  0xa1   :  { %v202_v39 = vadd.f32 %v201_v38, %v178_v37  ;;  %v278_v40 = vpop.f32.mrf.mxu3 }
  0xa2   :  { %v223_v41 = vpop.f32.mrf.mxu1  ;;  %v252_v42 = vpop.f32.mrf.mxu2 }
  0xa3   :  { %v224_v43 = vadd.f32 %v223_v41, %v202_v39  ;;  %v279_v44 = vadd.f32 %v278_v40, %v252_v42 }
  0xa5   :  { %v375_v45 = vmul.f32 1.442695, %v224_v43 }
  0xa7   :  { %788 = vpow2.f32 %v375_v45  ;;  %v302_v46 = vpop.f32.mrf.mxu0 }
  0xa8   :  { %v303_v47 = vadd.f32 %v302_v46, %v279_v44  ;;  %v398_v46 = vld [vmem:[#allocation2 + $0x1] sm:$0x1] }
  0xa9   :  { %v372_v52 = vpop.f32.mrf.mxu3 }
  0xaa   :  { %v326_v48 = vpop.f32.mrf.mxu1  ;;  %v350_v49 = vpop.f32.mrf.mxu2 }
  0xab   :  { %v327_v50 = vadd.f32 %v326_v48, %v303_v47 }
  0xad   :  { %v789_v53 = vpop.eup %788  ;;  %v351_v54 = vadd.f32 %v350_v49, %v327_v50 }
  0xae   :  { %v381_v55 = vmul.f32 %v789_v53, %v379_v51 }
  0xaf   :  { %v373_v56 = vadd.f32 %v372_v52, %v351_v54 }
  0xb0   :  { %v386_v57 = vsel %vm385_vm1, %v381_v55, 0.0  ;;  %v401_v58 = vsel %vm399_vm2, %v381_v55, 0 }
  0xb1   :  { %v377_v60 = vmul.f32 1.442695, %v373_v56  ;;  %v420_v61 = vand.u32 4294901760, %v401_v58  ;;  %387 = vadd.xlane.f32.xlu0 %v386_v57 }
  0xb3   :  { %790 = vpow2.f32 %v377_v60  ;;  %v421_v62 = vsub.f32 %v401_v58, %v420_v61  ;;  %451 = vmatmul.f32.vlgmr.msrb.gmra.mxu1 %v420_v61 }
  0xb4   :  { %644 = vmatpush.msrb.mxu1 %v940_v23 }
  0xb5   :  { %475 = vmatmul.f32.vlgmr.msrb.gmra.mxu2 %v421_v62  ;;  %v422_v63 = vand.u32 4294901760, %v421_v62 }
  0xb6   :  { %670 = vmatpush.msrb.mxu2 %v595_v29 }
  0xb7   :  { %499 = vmatmul.f32.vlgmr.msrb.gmra.mxu3 %v422_v63  ;;  %v423_v0 = vsub.f32 %v421_v62, %v422_v63 }
  0xb8   :  { %692 = vmatpush.msrb.mxu3 %v940_v23 }
  0xb9   :  { %v791_v2 = vpop.eup %790  ;;  %v424_v3 = vand.u32 4294901760, %v423_v0 }
  0xba   :  { %v382_v4 = vmul.f32 %v791_v2, %v380_v1 }
  0xbb   :  { %425 = vmatmul.f32.vlgmr.msrb.gmra.mxu0 %v424_v3  ;;  %545 = vmatmul.f32.vlgmr.msra.gmra.mxu1 %v420_v61 }
  0xbc   :  { %v389_v5 = vsel %vm385_vm1, %v382_v4, 0.0  ;;  %v550_v6 = vsel %vm399_vm2, %v382_v4, 0  ;;  %621 = vmatpush.msrb.mxu0 %v594_v27 }
  0xbd   :  { %v569_v7 = vand.u32 4294901760, %v550_v6  ;;  %390 = vadd.xlane.f32.xlu0 %v389_v5 }
  0xbf   :  { %v570_v8 = vsub.f32 %v550_v6, %v569_v7  ;;  %600 = vmatmul.f32.vlgmr.msra.gmra.mxu3 %v569_v7 }
  0xc1   :  { %v571_v9 = vand.u32 4294901760, %v570_v8 }
  0xc3   :  { %523 = vmatmul.f32.vlgmr.msra.gmra.mxu0 %v420_v61  ;;  %648 = vmatmul.f32.vlgmr.msrb.gmra.mxu1 %v571_v9  ;;  %v572_v10 = vsub.f32 %v570_v8, %v571_v9 }
  0xc5   :  { %v573_v11 = vand.u32 4294901760, %v572_v10 }
  0xc7   :  { %574 = vmatmul.f32.vlgmr.msra.gmra.mxu2 %v573_v11  ;;  %694 = vmatmul.f32.vlgmr.msrb.gmra.mxu3 %v569_v7 }
  0xcb   :  { %624 = vmatmul.f32.vlgmr.msrb.gmra.mxu0 %v570_v8 }
  0xcf   :  { %672 = vmatmul.f32.vlgmr.msrb.gmra.mxu2 %v569_v7 }
 0x124   :  { %v388_v14 = vpop.xlane.xlu0 %387 }
 0x125   :  { %v392_v15 = vadd.f32 %v388_v14, %v383_v13 }
 0x127   :  { %395 = vst.msk [vmem:[#allocation3] sm:$0x1] %vm67_vm3, %v392_v15 }
 0x12e   :  { %v708_v17 = vld [vmem:[#allocation3] sm:$0x1] }
 0x12f   :  { %v710_v18 = vadd.f32 1e-09, %v708_v17 }
 0x130   :  { %v391_v19 = vpop.xlane.xlu0 %390  ;;  %v452_v21 = vpop.f32.mrf.mxu1 }
 0x131   :  { %v393_v20 = vadd.f32 %v391_v19, %v384_v16  ;;  %714 = vperm.xlu1 %786, %v710_v18  }
 0x133   :  { %396 = vst.msk [vmem:[#allocation3 + $0x1] sm:$0x1] %vm67_vm3, %v393_v20 }
 0x138   :  { %v426_v22 = vpop.f32.mrf.mxu0  ;;  %v476_v24 = vpop.f32.mrf.mxu2 }
 0x139   :  { %v453_v23 = vadd.f32 %v452_v21, %v426_v22  ;;  %v546_v32 = vpop.f32.mrf.mxu1 }
 0x13a   :  { %v709_v25 = vld [vmem:[#allocation3 + $0x1] sm:$0x1]  ;;  %v500_v28 = vpop.f32.mrf.mxu3 }
 0x13b   :  { %v477_v26 = vadd.f32 %v476_v24, %v453_v23  ;;  %v711_v27 = vadd.f32 1e-09, %v709_v25 }
 0x13d   :  { %720 = vperm.xlu1 %786, %v711_v27   ;;  %v501_v29 = vadd.f32 %v500_v28, %v477_v26 }
 0x140   :  { %v524_v30 = vpop.f32.mrf.mxu0 }
 0x141   :  { %v525_v31 = vadd.f32 %v524_v30, %v501_v29  ;;  %v649_v41 = vpop.f32.mrf.mxu1 }
 0x142   :  { %v601_v36 = vpop.f32.mrf.mxu3 }
 0x143   :  { %v547_v34 = vadd.f32 %v546_v32, %v525_v31 }
 0x145   :  { %v698_v35 = vadd.f32 %v547_v34, %v397_v33 }
 0x147   :  { %701 = vst.msk [vmem:[#allocation2] sm:$0x1] %vm64_vm4, %v698_v35 }
 0x148   :  { %v625_v39 = vpop.f32.mrf.mxu0 }
 0x14a   :  { %v575_v37 = vpop.f32.mrf.mxu2  ;;  %v695_v45 = vpop.f32.mrf.mxu3 }
 0x14b   :  { %v602_v38 = vadd.f32 %v601_v36, %v575_v37 }
 0x14d   :  { %v626_v40 = vadd.f32 %v625_v39, %v602_v38 }
 0x14e   :  { %v706_v62 = vld [vmem:[#allocation2] sm:$0x1] }
 0x14f   :  { %v650_v42 = vadd.f32 %v649_v41, %v626_v40 }
 0x152   :  { %v673_v43 = vpop.f32.mrf.mxu2 }
 0x153   :  { %v674_v44 = vadd.f32 %v673_v43, %v650_v42 }
 0x155   :  { %v696_v47 = vadd.f32 %v695_v45, %v674_v44 }
 0x157   :  { %v699_v48 = vadd.f32 %v696_v47, %v398_v46 }
 0x159   :  { %702 = vst.msk [vmem:[#allocation2 + $0x1] sm:$0x1] %vm64_vm4, %v699_v48 }
 0x160   :  { %v707_v10 = vld [vmem:[#allocation2 + $0x1] sm:$0x1] }
 0x1a3   :  { %v715_v49 = vpop.permute.xlu1 %714 }
 0x1a4   :  { %v717_v50 = vperm.slane %v715_v49, 0 }
 0x1a6   :  { %792 = vrcp.f32 %v717_v50  ;;  %v735_v55 = vand.u32 2147483648, %v717_v50  ;;  %v733_v58 = vand.u32 2147483647, %v717_v50  ;;  %vm729_vm6 = vweird.f32 %v717_v50 }
 0x1a8   :  { %v736_v60 = vor.u32 1.1754944e-38, %v735_v55  ;;  %vm734_vm8 = vcmp.eq.f32.partialorder %v733_v58, 8.507059e+37 }
 0x1ac   :  { %v793_v51 = vpop.eup %792 }
 0x1ad   :  { %v725_v52 = vmul.f32 %v793_v51, %v717_v50  ;;  %vm730_vm5 = vweird.f32 %v793_v51 }
 0x1ae   :  { %vm731_vm7 = vmor %vm729_vm6, %vm730_vm5 }
 0x1af   :  { %v726_v53 = vsub.f32 1.0, %v725_v52  ;;  %v721_v54 = vpop.permute.xlu1 %720 }
 0x1b0   :  { %v723_v56 = vperm.slane %v721_v54, 0 }
 0x1b1   :  { %v727_v57 = vmul.f32 %v793_v51, %v726_v53 }
 0x1b2   :  { %794 = vrcp.f32 %v723_v56  ;;  %v750_v4 = vand.u32 2147483648, %v723_v56  ;;  %v748_v6 = vand.u32 2147483647, %v723_v56  ;;  %vm744_vm10 = vweird.f32 %v723_v56 }
 0x1b3   :  { %v728_v59 = vadd.f32 %v793_v51, %v727_v57 }
 0x1b4   :  { %v751_v8 = vor.u32 1.1754944e-38, %v750_v4  ;;  %vm749_vm12 = vcmp.eq.f32.partialorder %v748_v6, 8.507059e+37 }
 0x1b5   :  { %v732_v61 = vsel %vm731_vm7, %v793_v51, %v728_v59 }
 0x1b6   :  { %v737_v63 = vsel %vm734_vm8, %v736_v60, %v732_v61 }
 0x1b7   :  { %v738_v0 = vmul.f32 %v737_v63, %v706_v62 }
 0x1b8   :  { %v795_v1 = vpop.eup %794 }
 0x1b9   :  { %v740_v2 = vmul.f32 %v795_v1, %v723_v56  ;;  %754 = vst.msk [vmem:[#allocation10] sm:$0x1] %vm64_vm4, %v738_v0  ;;  %vm745_vm9 = vweird.f32 %v795_v1 }
 0x1ba   :  { %vm746_vm11 = vmor %vm744_vm10, %vm745_vm9 }
 0x1bb   :  { %v741_v3 = vsub.f32 1.0, %v740_v2 }
 0x1bd   :  { %v742_v5 = vmul.f32 %v795_v1, %v741_v3 }
 0x1bf   :  { %v743_v7 = vadd.f32 %v795_v1, %v742_v5 }
 0x1c1   :  { %v747_v9 = vsel %vm746_vm11, %v795_v1, %v743_v7 }
 0x1c2   :  { %v752_v11 = vsel %vm749_vm12, %v751_v8, %v747_v9 }
 0x1c3   :  { %v753_v12 = vmul.f32 %v752_v11, %v707_v10 }
 0x1c5   :  { %755 = vst.msk [vmem:[#allocation10 + $0x1] sm:$0x1] %vm64_vm4, %v753_v12 }
 0x1c6   :  { %768 = dma.vmem_to_hbm [thread:$0]  %s761_s2, 32, %s763_s5, [#allocation6], %s903_s28, %s903_s28, %s904_s29  }
 0x1c7   :  { %896 = dma.done.wait [#allocation6], 32  }
 0x1c8   :  { %897 = vsyncadd [#allocation6], 4294967264 }
 0x1c9   :  { %773 = vsyncpa [#allocation5], 1 }
 0x1ca   :  { %774 = vsyncpa [#allocation8], 1 }
 0x1cb   :  { %775 = vsyncpa [#allocation6], 1 }

</bundles_post_ra>
